<compile_context>
chip_gen: v7x
topology: tpu7x:2x2x1
jax: 0.10.0
libtpu: 0.0.40
codegen_flags: <defaults>
</compile_context>

<pallas_src>
import jax
import jax.numpy as jnp
from jax.experimental import pallas as pl
from jax.experimental.pallas import tpu as pltpu


# ---------------------------------------------------------------------------
# Kernels
# ---------------------------------------------------------------------------

def _spatial_sum_kernel(x_ref, sum_ref):
    # x_ref:   (1, tci, thw)  input chunk (lane-dense flattened H*W)
    # sum_ref: (1, tci, 1)    f32 accumulator, resident across the HW grid axis
    @pl.when(pl.program_id(2) == 0)
    def _():
        sum_ref[...] = jnp.zeros_like(sum_ref)
    # Accumulate in f32 without materializing an upcast copy of the tile.
    sum_ref[...] += jnp.sum(x_ref[...], axis=-1, dtype=jnp.float32)[..., None]


def _broadcast_kernel(y_ref, o_ref):
    # y_ref: (1, tco, 1)    per-image activations, already in the output dtype
    # o_ref: (1, tco, thw)  lane-dense output tile -> unmasked full-lane stores
    o_ref[...] = jnp.broadcast_to(y_ref[...], o_ref.shape)


# ---------------------------------------------------------------------------
# Tiling helper
# ---------------------------------------------------------------------------

def _choose_tile(n, cap, quantum):
    """Largest tile t dividing n with t <= cap and t % quantum == 0.
    Full extent (always a legal block) is used when n <= cap or no such
    divisor exists."""
    if n <= cap:
        return n
    t = (cap // quantum) * quantum
    while t >= quantum:
        if n % t == 0:
            return t
        t -= quantum
    return n


# ---------------------------------------------------------------------------
# Wrapper
# ---------------------------------------------------------------------------

def aspp_pooling(x, conv_w, gamma, beta, running_mean, running_var, eps=1e-5,
                 *, hw_tile_cap=8192, ch_tile_cap=512):
    """x: (B, C_in, H, W) NCHW; conv_w: (C_out, C_in, 1, 1). Eval-mode BN."""
    B, C_in, H, W = x.shape
    C_out = conv_w.shape[0]
    HW = H * W

    # Lane-dense spatial layout: last dim is H*W, not W.
    x2 = x.reshape(B, C_in, HW)

    # Tile sizes: ~<= 8192-lane HW chunks, ~<= 512-channel chunks keep each
    # block in the low-MiB range so double-buffering fits v7x's 64 MiB VMEM
    # (and v5e/v6e defaults) with many grid steps to hide DMA latency.
    thw = _choose_tile(HW, hw_tile_cap, 128)
    tci = _choose_tile(C_in, ch_tile_cap, 8)
    tco = _choose_tile(C_out, ch_tile_cap, 8)
    n_hw = HW // thw
    n_ci = C_in // tci
    n_co = C_out // tco

    vmem_limit = 48 * 1024 * 1024

    # ---- Pass 1: per-channel spatial sum (global average pool numerator) ----
    sums = pl.pallas_call(
        _spatial_sum_kernel,
        out_shape=jax.ShapeDtypeStruct((B, C_in, 1), jnp.float32),
        grid_spec=pltpu.PrefetchScalarGridSpec(
            num_scalar_prefetch=0,
            grid=(B, n_ci, n_hw),
            in_specs=[
                pl.BlockSpec((1, tci, thw), lambda b, ci, k: (b, ci, k)),
            ],
            out_specs=pl.BlockSpec((1, tci, 1), lambda b, ci, k: (b, ci, 0)),
        ),
        compiler_params=pltpu.CompilerParams(
            dimension_semantics=("parallel", "parallel", "arbitrary"),
            vmem_limit_bytes=vmem_limit),
    )(x2)

    # ---- Tiny 1x1 conv + folded BN (eval) + ReLU in plain JAX ----
    # TODO(synk): BatchNorm implemented in eval mode (running stats);
    # training-mode batch statistics over the pooled (B, C, 1, 1) tensor are
    # not reproduced.
    pooled = sums.reshape(B, C_in) * (1.0 / float(HW))                # (B, C_in) f32
    w_t = conv_w.reshape(C_out, C_in).T.astype(jnp.float32)           # (C_in, C_out)
    scale = (gamma / jnp.sqrt(running_var + eps)).astype(jnp.float32)
    shift = (beta - running_mean * scale).astype(jnp.float32)
    y = jnp.dot(pooled, w_t, preferred_element_type=jnp.float32)
    y = jnp.maximum(y * scale + shift, 0.0)
    y = y.astype(x.dtype)                                             # cast BEFORE broadcast
    y3 = y.reshape(B, C_out, 1)

    # ---- Pass 2: broadcast write back to (B, C_out, H*W) ----
    out2 = pl.pallas_call(
        _broadcast_kernel,
        out_shape=jax.ShapeDtypeStruct((B, C_out, HW), x.dtype),
        grid_spec=pltpu.PrefetchScalarGridSpec(
            num_scalar_prefetch=0,
            grid=(B, n_co, n_hw),
            in_specs=[
                pl.BlockSpec((1, tco, 1), lambda b, co, j: (b, co, 0)),
            ],
            out_specs=pl.BlockSpec((1, tco, thw), lambda b, co, j: (b, co, j)),
        ),
        compiler_params=pltpu.CompilerParams(
            dimension_semantics=("parallel", "parallel", "parallel"),
            vmem_limit_bytes=vmem_limit),
    )(y3)

    return out2.reshape(B, C_out, H, W)


# ---------------------------------------------------------------------------
# Pure-JAX reference
# ---------------------------------------------------------------------------

def aspp_pooling_ref(x, conv_w, gamma, beta, running_mean, running_var, eps=1e-5):
    B, C_in, H, W = x.shape
    C_out = conv_w.shape[0]
    pooled = jnp.mean(x.astype(jnp.float32), axis=(2, 3))             # (B, C_in)
    y = pooled @ conv_w.reshape(C_out, C_in).T.astype(jnp.float32)    # (B, C_out)
    y = (y - running_mean) / jnp.sqrt(running_var + eps) * gamma + beta
    y = jnp.maximum(y, 0.0)
    # F.interpolate of a 1x1 map to (H, W) with align_corners=True == broadcast
    return jnp.broadcast_to(y[:, :, None, None], (B, C_out, H, W)).astype(x.dtype)


if __name__ == "__main__":
    B, C_in, C_out, H, W = 2, 4, 8, 16, 16

    key = jax.random.PRNGKey(0)
    kx, kw, kg, kb, km, kv = jax.random.split(key, 6)

    x = jax.random.normal(kx, (B, C_in, H, W), dtype=jnp.float32)
    conv_w = jax.random.normal(kw, (C_out, C_in, 1, 1), dtype=jnp.float32) * 0.1
    gamma = 1.0 + 0.1 * jax.random.normal(kg, (C_out,), dtype=jnp.float32)
    beta = 0.1 * jax.random.normal(kb, (C_out,), dtype=jnp.float32)
    running_mean = 0.1 * jax.random.normal(km, (C_out,), dtype=jnp.float32)
    running_var = jnp.abs(1.0 + 0.1 * jax.random.normal(kv, (C_out,), dtype=jnp.float32))

    out = aspp_pooling(x, conv_w, gamma, beta, running_mean, running_var)
    out = jax.block_until_ready(out)

    ref = aspp_pooling_ref(x, conv_w, gamma, beta, running_mean, running_var)
    assert out.shape == (B, C_out, H, W)
    assert jnp.allclose(out, ref, atol=1e-5, rtol=1e-5)

    print("KERNEL_OK")
</pallas_src>

<mosaic_0001>
module attributes {stable_mosaic.version = 11 : i64} {
  func.func @_spatial_sum_kernel(%arg0: i32, %arg1: i32, %arg2: i32, %arg3: memref<1x4x256xf32, #tpu.memory_space<vmem>>, %arg4: memref<1x4x1xf32, #tpu.memory_space<vmem>>) attributes {dimension_semantics = [#tpu.dimension_semantics<parallel>, #tpu.dimension_semantics<parallel>, #tpu.dimension_semantics<arbitrary>], iteration_bounds = array<i64: 2, 1, 1>, scalar_prefetch = 0 : i64, scratch_operands = 0 : i64, tpu.core_type = #tpu.core_type<tc>, window_params = [{transform_indices = @transform_0, window_bounds = array<i64: 1, 4, 256>}, {transform_indices = @transform_1, window_bounds = array<i64: 1, 4, 1>}]} {
    %c0_i32 = arith.constant 0 : i32
    %0 = arith.cmpi eq, %arg2, %c0_i32 : i32
    %1 = arith.extui %0 : i1 to i32
    %c0_i32_0 = arith.constant 0 : i32
    %2 = arith.cmpi ne, %1, %c0_i32_0 : i32
    scf.if %2 {
      %cst_9 = arith.constant 0.000000e+00 : f32
      %9 = vector.broadcast %cst_9 : f32 to vector<1x4x1xf32>
      %c0_10 = arith.constant 0 : index
      %c0_11 = arith.constant 0 : index
      %c0_12 = arith.constant 0 : index
      %10 = vector.load %arg4[%c0_10, %c0_11, %c0_12] : memref<1x4x1xf32, #tpu.memory_space<vmem>>, vector<1x4x1xf32>
      tpu.vector_store %arg4[%c0_10, %c0_11, %c0_12], %9 {strides = array<i32>} : memref<1x4x1xf32, #tpu.memory_space<vmem>>, vector<1x4x1xf32>,
    } else {
    }
    %c0 = arith.constant 0 : index
    %c0_1 = arith.constant 0 : index
    %c0_2 = arith.constant 0 : index
    %3 = vector.load %arg4[%c0, %c0_1, %c0_2] : memref<1x4x1xf32, #tpu.memory_space<vmem>>, vector<1x4x1xf32>
    %c0_3 = arith.constant 0 : index
    %c0_4 = arith.constant 0 : index
    %c0_5 = arith.constant 0 : index
    %4 = vector.load %arg3[%c0_3, %c0_4, %c0_5] : memref<1x4x256xf32, #tpu.memory_space<vmem>>, vector<1x4x256xf32>
    %cst = arith.constant dense<0.000000e+00> : vector<1x4xf32>
    %5 = vector.multi_reduction <add>, %4, %cst [2] : vector<1x4x256xf32> to vector<1x4xf32>
    %6 = vector.shape_cast %5 : vector<1x4xf32> to vector<1x4x1xf32>
    %7 = arith.addf %3, %6 : vector<1x4x1xf32>
    %c0_6 = arith.constant 0 : index
    %c0_7 = arith.constant 0 : index
    %c0_8 = arith.constant 0 : index
    %8 = vector.load %arg4[%c0_6, %c0_7, %c0_8] : memref<1x4x1xf32, #tpu.memory_space<vmem>>, vector<1x4x1xf32>
    tpu.vector_store %arg4[%c0_6, %c0_7, %c0_8], %7 {strides = array<i32>} : memref<1x4x1xf32, #tpu.memory_space<vmem>>, vector<1x4x1xf32>,
    return
  }
  func.func @transform_0(%arg0: i32, %arg1: i32, %arg2: i32) -> (i32, i32, i32) {
    %c0_i32 = arith.constant 0 : i32
    return %arg0, %arg1, %arg2 : i32, i32, i32
  }
  func.func @transform_1(%arg0: i32, %arg1: i32, %arg2: i32) -> (i32, i32, i32) {
    %c0_i32 = arith.constant 0 : i32
    %c0_i32_0 = arith.constant 0 : i32
    return %arg0, %arg1, %c0_i32 : i32, i32, i32
  }
}

</mosaic_0001>

<bundles_post_ra>
// kernel: tpu_custom_call.1
= control target key start
LH: loop header
LB: loop body
LE: loop exit
PB: predicated region body
PF: predicated region fallthrough
CT: control target
= control target key end

     0   :  { %6 = vsyncpa [#allocation3], 0  ;;  %s569_s0 = inlined_call_operand.hbm [shape: f32[2,4,256], index: 0, kind: input, shape index: {}]   ;;  %s570_s1 = inlined_call_operand.vmem [shape: f32[2,4,1], index: 1, kind: output, shape index: {}]  }
   0x1   :  { %8 = vsyncpa [#allocation3 + $0x1], 0  ;;  %s444_s6 = smov 0   ;;  %s446_s7 = smov 0  }
   0x2   :  { %s448_s8 = smov 0   ;;  %s450_s9 = smov 0  }
   0x3   :  { %s452_s10 = smov 0   ;;  %s454_s11 = smov 0  }
   0x4 LB: > { %s280_s12 = sadd.s32 4294967295, %s430_s11   ;;  %s33_s13 = sadd.s32 1, %s426_s10  ;;  %s430_s11 = sphi %s454_s11, %s14_s11   ;;  %s426_s10 = sphi %s452_s10, %s580_s10   ;;  %s422_s9 = sphi %s450_s9, %s579_s9   ;;  %s418_s8 = sphi %s448_s8, %s578_s8   ;;  %s414_s7 = sphi %s446_s7, %s577_s7   ;;  %s410_s6 = sphi %s444_s6, %s576_s6  }
   0x5   : > { %p35_p0 = scmp.ge.s32.totalorder %s33_s13, 2  ;;  %s44_s14 = sadd.s32 1, %s418_s8 }
   0x6   : > { %p51_p1 = scmp.ne.s32.totalorder %s418_s8, %s414_s7  ;;  %p52_p2 = scmp.eq.s32.totalorder %s430_s11, 0 }
   0x7   : > { %s582_s13 = smov (%p35_p0, %s33_s13), 0  ;;  %p57_p4 = scmp.ne.s32.totalorder %s414_s7, %s410_s6 }
   0x8   : > { %p480_p3 = por %p52_p2, %p51_p1  ;;  %s37_s16 = ssub.s32 %s426_s10, %s582_s13 }
   0x9   : > { %p58_p5 = scmp.eq.s32.totalorder %s280_s12, 0  ;;  %p42_p6 = scmp.eq.s32.totalorder %s37_s16, 0 }
   0xa   : > { %p299_p8 = scmp.lt.s32.totalorder %s430_s11, 2  ;;  %s109_s19 = sand.u32 1, %s418_s8  }
   0xb   : > { %p487_p7 = por %p58_p5, %p57_p4  ;;  %s292_s20 = sshll.u32 %s426_s10, 7 }
   0xc   : > { %s493_s18 = scalar_select %p42_p6, %s418_s8, %s44_s14  }
   0xd   : > { %s284_s21 = sshll.u32 %s109_s19, 3  ;;  %s500_s24 = scalar_lea.hbm %s569_s0, %s292_s20 }
   0xe   : > { %s113_s25 = scalar_lea.vmem [#allocation2], %s284_s21  ;;  %p504_p9 = pnand %p299_p8, %p480_p3 }
   0xf   : > { %s125_s26 = sshll.u32 %s113_s25, 4  ;;  %s110_s28 = scalar_lea.sflag [#allocation3], %s109_s19  ;;  %s508_s26 = int_to_ptr.vmem [resolvable:$true] %s125_s26 }
  0x10   : > { %s350_s29 = scalar_lea.hbm %s500_s24, 128  ;;  %p352_p13 = pneg %p504_p9 }
  0x11   : > { %p351_p12 = scmp.ne.s32.totalorder %s500_s24, %s350_s29  ;;  %s355_s3 = scalar_lea.hbm %s569_s0, 256 }
  0x12   : > { %p356_p2 = scmp.lt.u32.totalorder %s500_s24, %s569_s0  ;;  %p357_p3 = scmp.lt.u32.totalorder %s355_s3, %s350_s29 }
  0x13   : > { %p353_p0 = pnand %p352_p13, %p351_p12  ;;  %p359_p5 = scmp.lt.u32.totalorder %s350_s29, %s500_s24 }
  0x14   : > { %p358_p4 = por %p357_p3, %p356_p2 }
  0x15   : > { %p354_p1 = pneg %p353_p0 }
  0x16   : > { %p360_p6 = por %p359_p5, %p358_p4 }
  0x18   : > { %p361_p8 = pnand %p360_p6, %p354_p1 }
  0x1a   : > { %364 = shalt.err (!%p361_p8)
}
  0x1b   : > { %s365_s6 = scalar_lea.vmem %s508_s26, 128  ;;  %s432_s12 = smov [#allocation2]  }
  0x1c   : > { %p366_p12 = scmp.ne.s32.totalorder %s508_s26, %s365_s6  ;;  %s370_s14 = sshll.u32 %s432_s12, 4  ;;  %s371_s14 = int_to_ptr.vmem [resolvable:$false] %s370_s14 }
  0x1d   : > { %s372_s15 = scalar_lea.vmem %s371_s14, 256  ;;  %p373_p11 = scmp.lt.s32.totalorder %s508_s26, %s371_s14 }
  0x1e   : > { %p368_p0 = pnand %p366_p12, %p352_p13  ;;  %p374_p2 = scmp.lt.s32.totalorder %s372_s15, %s365_s6 }
  0x20   : > { %p369_p10 = pneg %p368_p0  ;;  %p375_p3 = por %p374_p2, %p373_p11 }
  0x22   : > { %p376_p4 = pnand %p375_p3, %p369_p10 }
  0x24   : > { %379 = shalt.err (!%p376_p4)
}
  0x25   : > { %298 = dma.hbm_to_vmem [thread:$0]  (!%p504_p9), %s500_s24, 128, %s508_s26, %s110_s28  }
  0x26   : > { %p574_p1 = scmp.lt.s32.totalorder %s430_s11, 3  ;;  %p575_p5 = scmp.ge.s32.totalorder %s430_s11, 1 }
  0x28   : > { %p131_p13 = pnand %p575_p5, %p574_p1 }
  0x29   : > { %s136_s16 = sand.u32 (!%p131_p13), 1, %s414_s7  }
  0x2a   : > { %134 = sbr.rel (%p131_p13) target bundleno = 201 (0xc9), region = 24  ;;  %s288_s19 = sshll.u32 (!%p131_p13), %s136_s16, 3 }
  0x2b   : > { %s137_s20 = scalar_lea.sflag (!%p131_p13), [#allocation3], %s136_s16  ;;  %s140_s21 = scalar_lea.vmem (!%p131_p13), [#allocation2], %s288_s19 }
  0x31   : > { %405 = dma.done.wait (%p487_p7), %s137_s20, 128  }
  0x32   : > { %407 = vsyncadd (%p487_p7), %s137_s20, 4294967168  ;;  %p162_p10 = scmp.lt.s32.totalorder %s422_s9, 1  ;;  %vm173_vm0 = vcmask 3072   ;;  %vm180_vm1 = vcmask 1043456   ;;  %v433_v0 = vmov 0.0   ;;  %v176_v1 = vld [vmem:[%s140_s21] sm:$0xff] }
  0x33   : > { %v178_v2 = vcombine.high %v176_v1, %v176_v1  ;;  %v181_v3 = vsel %vm180_vm1, %v176_v1, 0.0 }
  0x34   : > { %s584_s9 = smov (!%p162_p10, %s422_s9), 1 }
  0x35   : > { %s289_s22 = sshll.u32 %s584_s9, 2  ;;  %v182_v4 = vsel %vm180_vm1, %v178_v2, 0.0 }
  0x36   : > { %s168_s25 = scalar_lea.vmem %s570_s1, %s289_s22  ;;  %v183_v5 = vadd.f32 %v182_v4, %v181_v3 }
  0x37   : > { %174 = vst.msk [vmem:[%s168_s25] sm:$0xf] %vm173_vm0, %v433_v0 }
  0x38   : > { %184 = vadd.xlane.f32.xlu0 %v183_v5 }
  0x3e   : > { %v175_v6 = vld [vmem:[%s168_s25] sm:$0xf] }
  0xc5   : > { %v185_v7 = vpop.xlane.xlu0 %184 }
  0xc6   : > { %v186_v8 = vadd.f32 %v185_v7, %v175_v6 }
  0xc8   : > { %188 = vst.msk [vmem:[%s168_s25] sm:$0xf] %vm173_vm0, %v186_v8 }
  0xc9 PF: > { %s14_s11 = sadd.s32 1, %s430_s11   ;;  %s576_s6 = smov %s414_s7 }
  0xca   : > { %p11_p7 = scmp.ge.s32.totalorder %s14_s11, 4   ;;  %s577_s7 = smov %s418_s8 }
  0xcb   : > { %s578_s8 = smov %s493_s18  ;;  %s579_s9 = smov %s426_s10 }
  0xcc   : > { %s580_s10 = smov %s582_s13  ;;  %13 = sbr.rel (!%p11_p7) target bundleno = 4 (0x4), region = 68 }
  0xd3   :  { %214 = vsyncpa [#allocation3], 1 }
  0xd4   :  { %216 = vsyncpa [#allocation3 + $0x1], 1 }

</bundles_post_ra>
